<compile_context>
chip_gen: v5e
topology: v5e:2x2
jax: 0.10.0
libtpu: 0.0.40
codegen_flags: <defaults>
</compile_context>

<pallas_src>
import functools

import jax
import jax.numpy as jnp
from jax.experimental import pallas as pl
from jax.experimental.pallas import tpu as pltpu

HIDDEN = 256          # hidden width of the two 256-unit layers (fixed by module)
LANE = 128            # TPU lane width
SUBLANES = 16         # sublane multiple valid for both bf16 (16) and f32 (8) blocks
VMEM_BUDGET = 40 * 1024 * 1024   # per-tile budget (headroom under v7x 64 MiB VMEM)


def _round_up(n, m):
    return ((n + m - 1) // m) * m


# ---------------------------------------------------------------------------
# Kernel: one batch tile per grid step, all four matmuls + ReLUs fused.
# ---------------------------------------------------------------------------
def _ae_kernel(x_ref, w_in_ref, w_out_ref, bias_ref, rec_ref, lat_ref,
               *, in_pad, lat_pad):
    # x_ref    : (TB, in_pad)                    bf16
    # w_in_ref : (in_pad + lat_pad, HIDDEN)      bf16   rows = [w1 ; w3]
    # w_out_ref: (HIDDEN, lat_pad + in_pad)      bf16   cols = [w2 | w4]
    # bias_ref : (4, bias_width)                 f32    rows = b1, b2, b3, b4 (padded)
    # rec_ref  : (TB, in_pad)                    f32
    # lat_ref  : (TB, lat_pad)                   f32
    x = x_ref[...]                                     # already bf16

    w1 = w_in_ref[:in_pad, :]
    w3 = w_in_ref[in_pad:, :]
    w2 = w_out_ref[:, :lat_pad]
    w4 = w_out_ref[:, lat_pad:]

    b1 = bias_ref[0:1, :HIDDEN]
    b2 = bias_ref[1:2, :lat_pad]
    b3 = bias_ref[2:3, :HIDDEN]
    b4 = bias_ref[3:4, :in_pad]

    # ---- encoder ----
    h1 = jnp.dot(x, w1, preferred_element_type=jnp.float32) + b1
    h1 = jnp.maximum(h1, 0.0)                                   # ReLU (f32, VPU)

    lat = jnp.dot(h1.astype(jnp.bfloat16), w2,
                  preferred_element_type=jnp.float32) + b2
    lat = jnp.maximum(lat, 0.0)                                 # ReLU

    # ---- decoder ----
    h2 = jnp.dot(lat.astype(jnp.bfloat16), w3,
                 preferred_element_type=jnp.float32) + b3
    h2 = jnp.maximum(h2, 0.0)                                   # ReLU

    rec = jnp.dot(h2.astype(jnp.bfloat16), w4,
                  preferred_element_type=jnp.float32) + b4

    # Lane-dense, unmasked stores (both widths are multiples of 128).
    rec_ref[...] = rec.astype(rec_ref.dtype)
    lat_ref[...] = lat.astype(lat_ref.dtype)


# ---------------------------------------------------------------------------
# Wrapper
# ---------------------------------------------------------------------------
def autoencoder_forward(x, packed, *, latent_size, tile_batch=512):
    """x: (B, input_size) f32/bf16. packed: dict from pack_params(). -> (recon, latent)."""
    B, input_size = x.shape
    in_pad = _round_up(input_size, LANE)
    lat_pad = _round_up(latent_size, LANE)
    bias_shape = packed["bias"].shape

    # ---- batch tile selection -------------------------------------------------
    # Sublane-safe tile (multiple of 16 works for both the bf16 input block and
    # the f32 output blocks).
    tb = _round_up(min(tile_batch, max(B, SUBLANES)), SUBLANES)

    # VMEM accounting: double-buffered x/out tiles + resident weights/bias +
    # rough activation scratch. Shrink tb until it fits the budget.
    weight_bytes = 2 * (packed["w_in"].size * 2 + packed["w_out"].size * 2
                        + packed["bias"].size * 4)
    per_row = (2 * in_pad * 2                     # double-buffered bf16 x tile
               + 2 * in_pad * 4                   # double-buffered f32 recon tile
               + 2 * lat_pad * 4                  # double-buffered f32 latent tile
               + (2 * HIDDEN + in_pad + lat_pad) * 4   # f32 activations
               + (2 * HIDDEN + lat_pad) * 2)           # bf16 MXU-input casts
    while tb > SUBLANES and weight_bytes + tb * per_row > VMEM_BUDGET:
        tb = max(SUBLANES, _round_up(tb // 2, SUBLANES))

    # Megacore: guarantee >=2 grid steps whenever the batch allows it so the
    # "parallel" batch axis actually feeds both TensorCores on v7x.
    if B > SUBLANES and _round_up(B, tb) // tb < 2:
        tb = _round_up(pl.cdiv(B, 2), SUBLANES)

    b_pad = _round_up(B, tb)
    grid = (b_pad // tb,)

    # ---- input staging (skip the pad pass when shapes already align) ----------
    if b_pad == B and in_pad == input_size:
        x_p = x.astype(jnp.bfloat16)
    else:
        x_p = (jnp.zeros((b_pad, in_pad), jnp.bfloat16)
               .at[:B, :input_size].set(x.astype(jnp.bfloat16)))

    vmem_limit = int(min(max((weight_bytes + tb * per_row) * 5 // 4,
                             32 * 1024 * 1024),
                         48 * 1024 * 1024))

    flops = 2 * b_pad * (in_pad * HIDDEN + HIDDEN * lat_pad
                         + lat_pad * HIDDEN + HIDDEN * in_pad)
    bytes_accessed = (x_p.size * 2
                      + packed["w_in"].size * 2 + packed["w_out"].size * 2
                      + packed["bias"].size * 4
                      + b_pad * (in_pad + lat_pad) * 4)

    kernel = functools.partial(_ae_kernel, in_pad=in_pad, lat_pad=lat_pad)

    rec_p, lat_p = pl.pallas_call(
        kernel,
        out_shape=(jax.ShapeDtypeStruct((b_pad, in_pad), jnp.float32),
                   jax.ShapeDtypeStruct((b_pad, lat_pad), jnp.float32)),
        grid=grid,
        in_specs=[
            pl.BlockSpec((tb, in_pad), lambda i: (i, 0)),                  # x tile
            pl.BlockSpec((in_pad + lat_pad, HIDDEN), lambda i: (0, 0)),    # [w1;w3] resident
            pl.BlockSpec((HIDDEN, lat_pad + in_pad), lambda i: (0, 0)),    # [w2|w4] resident
            pl.BlockSpec(bias_shape, lambda i: (0, 0)),                    # packed biases
        ],
        out_specs=(
            pl.BlockSpec((tb, in_pad), lambda i: (i, 0)),                  # recon
            pl.BlockSpec((tb, lat_pad), lambda i: (i, 0)),                 # latent
        ),
        compiler_params=pltpu.CompilerParams(
            dimension_semantics=("parallel",),      # megacore sharding on v7x
            vmem_limit_bytes=vmem_limit,
        ),
        cost_estimate=pl.CostEstimate(
            flops=flops, transcendentals=0, bytes_accessed=bytes_accessed),
    )(x_p, packed["w_in"], packed["w_out"], packed["bias"])

    # Slice only when padding was actually applied (avoids extra HBM passes).
    recon = rec_p if (b_pad == B and in_pad == input_size) \
        else rec_p[:B, :input_size]
    latent = lat_p if (b_pad == B and lat_pad == latent_size) \
        else lat_p[:B, :latent_size]
    return recon, latent


# ---------------------------------------------------------------------------
# Parameter helpers
# ---------------------------------------------------------------------------
def init_params(key, input_size, latent_size, hidden=HIDDEN):
    """Deterministic synthetic init; weights are (in, out) (transposed vs. PyTorch)."""
    ks = jax.random.split(key, 8)

    def lin(kw, kb, fan_in, fan_out):
        bound = 1.0 / jnp.sqrt(fan_in)
        w = jax.random.uniform(kw, (fan_in, fan_out), jnp.float32, -bound, bound)
        b = jax.random.uniform(kb, (fan_out,), jnp.float32, -bound, bound)
        return w, b

    w1, b1 = lin(ks[0], ks[1], input_size, hidden)       # Linear(input_size, 256)
    w2, b2 = lin(ks[2], ks[3], hidden, latent_size)      # Linear(256, latent_size)
    w3, b3 = lin(ks[4], ks[5], latent_size, hidden)      # Linear(latent_size, 256)
    w4, b4 = lin(ks[6], ks[7], hidden, input_size)       # Linear(256, input_size)
    return dict(w1=w1, b1=b1, w2=w2, b2=b2, w3=w3, b3=b3, w4=w4, b4=b4)


def pack_params(params, input_size, latent_size):
    """Zero-pad feature dims to 128 multiples and pack into 3 operands (bf16 weights)."""
    in_pad = _round_up(input_size, LANE)
    lat_pad = _round_up(latent_size, LANE)
    bias_width = max(HIDDEN, in_pad, lat_pad)   # holds b1..b4 even if dims > 256

    def pad2(w, rows, cols):
        return jnp.zeros((rows, cols), w.dtype).at[:w.shape[0], :w.shape[1]].set(w)

    w1 = pad2(params["w1"], in_pad, HIDDEN)
    w3 = pad2(params["w3"], lat_pad, HIDDEN)
    w2 = pad2(params["w2"], HIDDEN, lat_pad)
    w4 = pad2(params["w4"], HIDDEN, in_pad)

    w_in = jnp.concatenate([w1, w3], axis=0).astype(jnp.bfloat16)   # (in_pad+lat_pad, 256)
    w_out = jnp.concatenate([w2, w4], axis=1).astype(jnp.bfloat16)  # (256, lat_pad+in_pad)

    bias = jnp.zeros((4, bias_width), jnp.float32)
    bias = bias.at[0, :HIDDEN].set(params["b1"])
    bias = bias.at[1, :latent_size].set(params["b2"])
    bias = bias.at[2, :HIDDEN].set(params["b3"])
    bias = bias.at[3, :input_size].set(params["b4"])

    return dict(w_in=w_in, w_out=w_out, bias=bias)


def reference_forward(x, p, *, mxu_dtype=jnp.float32):
    """Plain-JAX reference mirroring the PyTorch module (optionally with bf16 MXU inputs)."""
    def dot(a, w):
        return jnp.dot(a.astype(mxu_dtype), w.astype(mxu_dtype),
                       preferred_element_type=jnp.float32)

    h1 = jnp.maximum(dot(x, p["w1"]) + p["b1"], 0.0)
    lat = jnp.maximum(dot(h1, p["w2"]) + p["b2"], 0.0)
    h2 = jnp.maximum(dot(lat, p["w3"]) + p["b3"], 0.0)
    rec = dot(h2, p["w4"]) + p["b4"]
    return rec, lat


if __name__ == "__main__":
    key = jax.random.PRNGKey(0)
    k_x, k_p = jax.random.split(key)

    batch = 64
    input_size = 64
    latent_size = 32

    x = jax.random.normal(k_x, (batch, input_size), jnp.float32)
    params = init_params(k_p, input_size, latent_size)
    packed = pack_params(params, input_size, latent_size)

    # tile_batch=16 at these tiny demo shapes -> tb=16, grid=(4,), exercising
    # the pipelined batch grid and megacore sharding; real workloads would use
    # the default 512-row tiles.
    fwd = jax.jit(functools.partial(autoencoder_forward,
                                    latent_size=latent_size, tile_batch=16))
    recon, latent = fwd(x, packed)
    jax.block_until_ready((recon, latent))

    assert recon.shape == (batch, input_size)
    assert latent.shape == (batch, latent_size)

    # Primary correctness check: mirror the kernel's bf16-MXU / f32-accumulate path.
    ref_rec_bf, ref_lat_bf = reference_forward(x, params, mxu_dtype=jnp.bfloat16)
    assert jnp.allclose(recon, ref_rec_bf, atol=1e-2, rtol=1e-2)
    assert jnp.allclose(latent, ref_lat_bf, atol=1e-2, rtol=1e-2)

    # Sanity check vs. full-f32 module semantics (loose: bf16 MXU rounding only).
    ref_rec, ref_lat = reference_forward(x, params, mxu_dtype=jnp.float32)
    assert jnp.linalg.norm(recon - ref_rec) <= 5e-2 * (jnp.linalg.norm(ref_rec) + 1e-6)
    assert jnp.linalg.norm(latent - ref_lat) <= 5e-2 * (jnp.linalg.norm(ref_lat) + 1e-6)

    print("KERNEL_OK")
</pallas_src>

<mosaic_0001>
module attributes {stable_mosaic.version = 11 : i64} {
  func.func @_ae_kernel(%arg0: i32, %arg1: memref<16x128xbf16, #tpu.memory_space<vmem>>, %arg2: memref<256x256xbf16, #tpu.memory_space<vmem>>, %arg3: memref<256x256xbf16, #tpu.memory_space<vmem>>, %arg4: memref<4x256xf32, #tpu.memory_space<vmem>>, %arg5: memref<16x128xf32, #tpu.memory_space<vmem>>, %arg6: memref<16x128xf32, #tpu.memory_space<vmem>>) attributes {dimension_semantics = [#tpu.dimension_semantics<parallel>], iteration_bounds = array<i64: 4>, scalar_prefetch = 0 : i64, scratch_operands = 0 : i64, tpu.core_type = #tpu.core_type<tc>, window_params = [{transform_indices = @transform_0, window_bounds = array<i64: 16, 128>}, {pipeline_mode = #tpu.pipeline_mode<synchronous>, transform_indices = @transform_1, window_bounds = array<i64: 256, 256>}, {pipeline_mode = #tpu.pipeline_mode<synchronous>, transform_indices = @transform_2, window_bounds = array<i64: 256, 256>}, {pipeline_mode = #tpu.pipeline_mode<synchronous>, transform_indices = @transform_3, window_bounds = array<i64: 4, 256>}, {transform_indices = @transform_4, window_bounds = array<i64: 16, 128>}, {transform_indices = @transform_5, window_bounds = array<i64: 16, 128>}]} {
    %c0 = arith.constant 0 : index
    %c0_0 = arith.constant 0 : index
    %0 = vector.load %arg1[%c0, %c0_0] : memref<16x128xbf16, #tpu.memory_space<vmem>>, vector<16x128xbf16>
    %c0_1 = arith.constant 0 : index
    %c0_2 = arith.constant 0 : index
    %1 = vector.load %arg2[%c0_1, %c0_2] : memref<256x256xbf16, #tpu.memory_space<vmem>>, vector<128x256xbf16>
    %c128 = arith.constant 128 : index
    %c0_3 = arith.constant 0 : index
    %2 = vector.load %arg2[%c128, %c0_3] : memref<256x256xbf16, #tpu.memory_space<vmem>>, vector<128x256xbf16>
    %c0_4 = arith.constant 0 : index
    %c0_5 = arith.constant 0 : index
    %3 = vector.load %arg3[%c0_4, %c0_5] : memref<256x256xbf16, #tpu.memory_space<vmem>>, vector<256x128xbf16>
    %c0_6 = arith.constant 0 : index
    %c128_7 = arith.constant 128 : index
    %4 = vector.load %arg3[%c0_6, %c128_7] : memref<256x256xbf16, #tpu.memory_space<vmem>>, vector<256x128xbf16>
    %c0_8 = arith.constant 0 : index
    %c0_9 = arith.constant 0 : index
    %5 = vector.load %arg4[%c0_8, %c0_9] : memref<4x256xf32, #tpu.memory_space<vmem>>, vector<1x256xf32>
    %c1 = arith.constant 1 : index
    %c0_10 = arith.constant 0 : index
    %6 = vector.load %arg4[%c1, %c0_10] : memref<4x256xf32, #tpu.memory_space<vmem>>, vector<1x128xf32>
    %c2 = arith.constant 2 : index
    %c0_11 = arith.constant 0 : index
    %7 = vector.load %arg4[%c2, %c0_11] : memref<4x256xf32, #tpu.memory_space<vmem>>, vector<1x256xf32>
    %c3 = arith.constant 3 : index
    %c0_12 = arith.constant 0 : index
    %8 = vector.load %arg4[%c3, %c0_12] : memref<4x256xf32, #tpu.memory_space<vmem>>, vector<1x128xf32>
    %cst = arith.constant dense<0.000000e+00> : vector<16x256xf32>
    %9 = tpu.matmul %0, %1, %cst {dimension_numbers = #tpu.dot_dimension_numbers<[1], [0], [0], [1], [0, 0, 1, 1], [], []>} : vector<16x128xbf16>, vector<128x256xbf16>, vector<16x256xf32> -> vector<16x256xf32>
    %10 = vector.broadcast %5 : vector<1x256xf32> to vector<16x256xf32>
    %11 = arith.addf %9, %10 : vector<16x256xf32>
    %cst_13 = arith.constant 0.000000e+00 : f32
    %12 = vector.broadcast %cst_13 : f32 to vector<16x256xf32>
    %13 = arith.maximumf %11, %12 : vector<16x256xf32>
    %14 = arith.truncf %13 : vector<16x256xf32> to vector<16x256xbf16>
    %cst_14 = arith.constant dense<0.000000e+00> : vector<16x128xf32>
    %15 = tpu.matmul %14, %3, %cst_14 {dimension_numbers = #tpu.dot_dimension_numbers<[1], [0], [0], [1], [0, 0, 1, 1], [], []>} : vector<16x256xbf16>, vector<256x128xbf16>, vector<16x128xf32> -> vector<16x128xf32>
    %16 = vector.broadcast %6 : vector<1x128xf32> to vector<16x128xf32>
    %17 = arith.addf %15, %16 : vector<16x128xf32>
    %cst_15 = arith.constant 0.000000e+00 : f32
    %18 = vector.broadcast %cst_15 : f32 to vector<16x128xf32>
    %19 = arith.maximumf %17, %18 : vector<16x128xf32>
    %20 = arith.truncf %19 : vector<16x128xf32> to vector<16x128xbf16>
    %cst_16 = arith.constant dense<0.000000e+00> : vector<16x256xf32>
    %21 = tpu.matmul %20, %2, %cst_16 {dimension_numbers = #tpu.dot_dimension_numbers<[1], [0], [0], [1], [0, 0, 1, 1], [], []>} : vector<16x128xbf16>, vector<128x256xbf16>, vector<16x256xf32> -> vector<16x256xf32>
    %22 = vector.broadcast %7 : vector<1x256xf32> to vector<16x256xf32>
    %23 = arith.addf %21, %22 : vector<16x256xf32>
    %cst_17 = arith.constant 0.000000e+00 : f32
    %24 = vector.broadcast %cst_17 : f32 to vector<16x256xf32>
    %25 = arith.maximumf %23, %24 : vector<16x256xf32>
    %26 = arith.truncf %25 : vector<16x256xf32> to vector<16x256xbf16>
    %cst_18 = arith.constant dense<0.000000e+00> : vector<16x128xf32>
    %27 = tpu.matmul %26, %4, %cst_18 {dimension_numbers = #tpu.dot_dimension_numbers<[1], [0], [0], [1], [0, 0, 1, 1], [], []>} : vector<16x256xbf16>, vector<256x128xbf16>, vector<16x128xf32> -> vector<16x128xf32>
    %28 = vector.broadcast %8 : vector<1x128xf32> to vector<16x128xf32>
    %29 = arith.addf %27, %28 : vector<16x128xf32>
    %c0_19 = arith.constant 0 : index
    %c0_20 = arith.constant 0 : index
    %30 = vector.load %arg5[%c0_19, %c0_20] : memref<16x128xf32, #tpu.memory_space<vmem>>, vector<16x128xf32>
    tpu.vector_store %arg5[%c0_19, %c0_20], %29 {strides = array<i32>} : memref<16x128xf32, #tpu.memory_space<vmem>>, vector<16x128xf32>,
    %c0_21 = arith.constant 0 : index
    %c0_22 = arith.constant 0 : index
    %31 = vector.load %arg6[%c0_21, %c0_22] : memref<16x128xf32, #tpu.memory_space<vmem>>, vector<16x128xf32>
    tpu.vector_store %arg6[%c0_21, %c0_22], %19 {strides = array<i32>} : memref<16x128xf32, #tpu.memory_space<vmem>>, vector<16x128xf32>,
    return
  }
  func.func @transform_0(%arg0: i32) -> (i32, i32) {
    %c0_i32 = arith.constant 0 : i32
    %c0_i32_0 = arith.constant 0 : i32
    return %arg0, %c0_i32 : i32, i32
  }
  func.func @transform_1(%arg0: i32) -> (i32, i32) {
    %c0_i32 = arith.constant 0 : i32
    %c0_i32_0 = arith.constant 0 : i32
    %c0_i32_1 = arith.constant 0 : i32
    return %c0_i32, %c0_i32_0 : i32, i32
  }
  func.func @transform_2(%arg0: i32) -> (i32, i32) {
    %c0_i32 = arith.constant 0 : i32
    %c0_i32_0 = arith.constant 0 : i32
    %c0_i32_1 = arith.constant 0 : i32
    return %c0_i32, %c0_i32_0 : i32, i32
  }
  func.func @transform_3(%arg0: i32) -> (i32, i32) {
    %c0_i32 = arith.constant 0 : i32
    %c0_i32_0 = arith.constant 0 : i32
    %c0_i32_1 = arith.constant 0 : i32
    return %c0_i32, %c0_i32_0 : i32, i32
  }
  func.func @transform_4(%arg0: i32) -> (i32, i32) {
    %c0_i32 = arith.constant 0 : i32
    %c0_i32_0 = arith.constant 0 : i32
    return %arg0, %c0_i32 : i32, i32
  }
  func.func @transform_5(%arg0: i32) -> (i32, i32) {
    %c0_i32 = arith.constant 0 : i32
    %c0_i32_0 = arith.constant 0 : i32
    return %arg0, %c0_i32 : i32, i32
  }
}

</mosaic_0001>

<bundles_post_ra>
// kernel: autoencoder_forward.1
= control target key start
LH: loop header
LB: loop body
LE: loop exit
PB: predicated region body
PF: predicated region fallthrough
CT: control target
= control target key end

     0   :  { %11 = vsyncpa [#allocation3], 0  ;;  %s1729_s0 = inlined_call_operand.vmem [shape: bf16[64,128], index: 0, kind: input, shape index: {}]   ;;  %s1730_s1 = inlined_call_operand.hbm [shape: bf16[256,256], index: 1, kind: input, shape index: {}]   ;;  %s1731_s2 = inlined_call_operand.hbm [shape: bf16[256,256], index: 2, kind: input, shape index: {}]   ;;  %s1732_s3 = inlined_call_operand.vmem [shape: f32[4,256], index: 3, kind: input, shape index: {}]   ;;  %s1733_s4 = inlined_call_operand.hbm [shape: f32[64,128], index: 4, kind: output, shape index: {0}]   ;;  %s1734_s5 = inlined_call_operand.vmem [shape: f32[64,128], index: 5, kind: output, shape index: {1}]  }
   0x1   :  { %12 = vsyncpa [#allocation6], 0 }
   0x2   :  { %13 = vsyncpa [#allocation4], 0 }
   0x3   :  { %15 = vsyncpa [#allocation4 + $0x1], 0  ;;  %s1591_s18 = smov 0   ;;  %s1593_s19 = smov 0  }
   0x4   :  { %s1595_s20 = smov 0   ;;  %s1597_s21 = smov 0  }
   0x5 LB: > { %s1612_s22 = sadd.s32 4294967295, %s1553_s21   ;;  %s1012_s23 = sadd.s32 4294967294, %s1553_s21   ;;  %s1553_s21 = sphi %s1597_s21, %s1742_s21   ;;  %s1549_s20 = sphi %s1595_s20, %s1741_s20   ;;  %s1545_s19 = sphi %s1593_s19, %s1740_s19   ;;  %s1541_s18 = sphi %s1591_s18, %s1739_s18  }
   0x6   : > { %s1616_s24 = sadd.s32 1, %s1553_s21   ;;  %s117_s25 = sadd.s32 1, %s1549_s20 }
   0x7   : > { %s114_s26 = ssub.s32 %s1553_s21, %s1616_s24  ;;  %p127_p0 = scmp.ne.s32.totalorder %s1549_s20, %s1545_s19 }
   0x8   : > { %p115_p1 = scmp.eq.s32.totalorder %s114_s26, 0  ;;  %p128_p2 = scmp.eq.s32.totalorder %s1612_s22, 3 }
   0x9   : > { %p133_p3 = scmp.ne.s32.totalorder %s1545_s19, %s1541_s18  ;;  %p134_p4 = scmp.eq.s32.totalorder %s1012_s23, 3 }
   0xa   : > { %s1627_s27 = scalar_select %p115_p1, %s1549_s20, %s117_s25  }
   0xb   : > { %p1629_p5 = por %p128_p2, %p127_p0  ;;  %p1633_p6 = por %p134_p4, %p133_p3 }
   0xc   : > { %p1013_p7 = scmp.ge.s32.totalorder %s1553_s21, 1  ;;  %p167_p8 = scmp.lt.s32.totalorder %s1553_s21, 5 }
   0xd   : > { %p1378_p9 = scmp.eq.s32.totalorder %s1612_s22, 0  ;;  %s178_s8 = sshll.u32 %s1730_s1, 4  ;;  %s179_s8 = int_to_ptr.hbm [resolvable:$true] %s178_s8 }
   0xe   : > { %p1640_p10 = pnand %p1013_p7, %p167_p8  ;;  %s1555_s9 = smov [#allocation2]  }
   0xf   : > { %s180_s10 = sshll.u32 %s1555_s9, 4  ;;  %s192_s13 = sshll.u32 %s1731_s2, 4  ;;  %s181_s10 = int_to_ptr.vmem [resolvable:$true] %s180_s10  ;;  %s193_s13 = int_to_ptr.hbm [resolvable:$true] %s192_s13 }
  0x10   : > { %p1367_p11 = pneg %p1640_p10  ;;  %s1556_s14 = smov 128  }
  0x11   : > { %s1557_s15 = smov 8   ;;  %s1558_s16 = smov [#allocation5]  }
  0x12   : > { %p1368_p12 = pnand %p1378_p9, %p1367_p11  ;;  %s194_s17 = sshll.u32 %s1558_s16, 4  ;;  %s195_s17 = int_to_ptr.vmem [resolvable:$true] %s194_s17 }
  0x13   : > { %222 = sbr.rel (%p1640_p10) target bundleno = 637 (0x27d), region = 36 }
  0x14   : > { %1370 = dma.hbm_to_vmem [thread:$0]  (!%p1368_p12), %s179_s8, 4096, %s181_s10, [#allocation3], %s1556_s14, %s1556_s14, %s1557_s15  }
  0x15   : > { %1373 = dma.hbm_to_vmem [thread:$0]  (!%p1368_p12), %s193_s13, 4096, %s195_s17, [#allocation6], %s1556_s14, %s1556_s14, %s1557_s15  }
  0x18   : > { %1528 = dma.done.wait (%p1378_p9), [#allocation3], 4096  }
  0x19   : > { %1530 = vsyncadd (%p1378_p9), [#allocation3], 4294963200 }
  0x1a   : > { %1532 = dma.done.wait (%p1378_p9), [#allocation6], 4096  }
  0x1b   : > { %1534 = vsyncadd (%p1378_p9), [#allocation6], 4294963200  ;;  %v1088_v0 = vld [vmem:[#allocation2 + $0x70] sm:$0xf]  ;;  %v1307_v1 = vld [vmem:[#allocation2 + $0x74] sm:$0xf0] }
  0x1c   : > { %v1306_v2 = vld [vmem:[#allocation2 + $0x74] sm:$0xf]  ;;  %v1089_v3 = vor.u32 %v1307_v1, %v1088_v0  ;;  %v1090_v4 = vld [vmem:[#allocation2 + $0x78] sm:$0xf0]  ;;  %v1080_v5 = vld [vmem:[#allocation2 + $0x60] sm:$0xf] }
  0x1d   : > { %v1305_v6 = vld [vmem:[#allocation2 + $0x64] sm:$0xf0]  ;;  %v1093_v7 = vor.u32 %v1306_v2, %v1090_v4  ;;  %v1304_v8 = vld [vmem:[#allocation2 + $0x64] sm:$0xf]  ;;  %v1082_v9 = vld [vmem:[#allocation2 + $0x68] sm:$0xf0] }
  0x1e   : > { %468 = vmatpush.bf16.msra.mxu0 %v1089_v3  ;;  %v1081_v10 = vor.u32 %v1305_v6, %v1080_v5  ;;  %v1085_v11 = vor.u32 %v1304_v8, %v1082_v9  ;;  %v1072_v12 = vld [vmem:[#allocation2 + $0x50] sm:$0xf]  ;;  %v1303_v13 = vld [vmem:[#allocation2 + $0x54] sm:$0xf0]  ;;  %v1302_v14 = vld [vmem:[#allocation2 + $0x54] sm:$0xf] }
  0x1f   : > { %482 = vmatpush.bf16.msra.mxu1 %v1093_v7  ;;  %v1074_v15 = vld [vmem:[#allocation2 + $0x58] sm:$0xf0]  ;;  %v1073_v16 = vor.u32 %v1303_v13, %v1072_v12  ;;  %v1064_v18 = vld [vmem:[#allocation2 + $0x40] sm:$0xf]  ;;  %v1301_v19 = vld [vmem:[#allocation2 + $0x44] sm:$0xf0] }
  0x20   : > { %v1077_v17 = vor.u32 %v1302_v14, %v1074_v15  ;;  %v1300_v20 = vld [vmem:[#allocation2 + $0x44] sm:$0xf]  ;;  %v1066_v21 = vld [vmem:[#allocation2 + $0x48] sm:$0xf0]  ;;  %v1056_v22 = vld [vmem:[#allocation2 + $0x30] sm:$0xf]  ;;  %v1065_v24 = vor.u32 %v1301_v19, %v1064_v18 }
  0x21   : > { %v1299_v23 = vld [vmem:[#allocation2 + $0x34] sm:$0xf0]  ;;  %s1021_s23 = sshll.u32 %s1612_s22, 1  ;;  %v1298_v25 = vld [vmem:[#allocation2 + $0x34] sm:$0xf]  ;;  %v1069_v29 = vor.u32 %v1300_v20, %v1066_v21  ;;  %s1356_s6 = sshll.u32 %s1612_s22, 4 }
  0x22   : > { %469 = vmatpush.bf16.msra.mxu0 %v1081_v10  ;;  %v1124_v26 = vld [vmem:[#allocation5 + $0x70] sm:$0xf]  ;;  %v1331_v27 = vld [vmem:[#allocation5 + $0x74] sm:$0xf0]  ;;  %v1120_v32 = vld [vmem:[#allocation5 + $0x60] sm:$0xf]  ;;  %v1057_v40 = vor.u32 %v1299_v23, %v1056_v22  ;;  %s895_s10 = scalar_lea.hbm %s1733_s4, %s1356_s6 }
  0x23   : > { %483 = vmatpush.bf16.msra.mxu1 %v1085_v11  ;;  %v1156_v28 = vld [vmem:[#allocation5 + $0xf0] sm:$0xf]  ;;  %v1125_v30 = vor.u32 %v1331_v27, %v1124_v26  ;;  %v1339_v31 = vld [vmem:[#allocation5 + $0xf4] sm:$0xf0]  ;;  %v1330_v33 = vld [vmem:[#allocation5 + $0x64] sm:$0xf0] }
  0x24   : > { %v1058_v34 = vld [vmem:[#allocation2 + $0x38] sm:$0xf0]  ;;  %v1157_v35 = vor.u32 %v1339_v31, %v1156_v28  ;;  %v1152_v36 = vld [vmem:[#allocation5 + $0xe0] sm:$0xf]  ;;  %v1338_v37 = vld [vmem:[#allocation5 + $0xe4] sm:$0xf0]  ;;  %v1121_v39 = vor.u32 %v1330_v33, %v1120_v32 }
  0x25   : > { %v1048_v38 = vld [vmem:[#allocation2 + $0x20] sm:$0xf]  ;;  %p1667_p13 = scmp.lt.s32.totalorder %s1021_s23, 7  ;;  %599 = vmatpush.bf16.msra.mxu2 %v1125_v30  ;;  %v1297_v41 = vld [vmem:[#allocation2 + $0x24] sm:$0xf0]  ;;  %v1153_v42 = vor.u32 %v1338_v37, %v1152_v36  ;;  %v1061_v45 = vor.u32 %v1298_v25, %v1058_v34  ;;  %s1503_s17 = scalar_lea.hbm %s1733_s4, 64 }
  0x26   : > { %470 = vmatpush.bf16.msra.mxu0 %v1073_v16  ;;  %613 = vmatpush.bf16.msra.mxu3 %v1157_v35  ;;  %v1116_v43 = vld [vmem:[#allocation5 + $0x50] sm:$0xf]  ;;  %v1329_v44 = vld [vmem:[#allocation5 + $0x54] sm:$0xf0]  ;;  %v1296_v46 = vld [vmem:[#allocation2 + $0x24] sm:$0xf]  ;;  %v1049_v51 = vor.u32 %v1297_v41, %v1048_v38 }
  0x27   : > { %484 = vmatpush.bf16.msra.mxu1 %v1077_v17  ;;  %v1148_v47 = vld [vmem:[#allocation5 + $0xd0] sm:$0xf]  ;;  %v1337_v48 = vld [vmem:[#allocation5 + $0xd4] sm:$0xf0]  ;;  %v1050_v49 = vld [vmem:[#allocation2 + $0x28] sm:$0xf0]  ;;  %v1117_v50 = vor.u32 %v1329_v44, %v1116_v43 }
  0x28   : > { %s1744_s23 = smov (!%p1667_p13, %s1021_s23), 7  ;;  %v1040_v52 = vld [vmem:[#allocation2 + $0x10] sm:$0xf]  ;;  %v1149_v53 = vor.u32 %v1337_v48, %v1148_v47  ;;  %v1112_v54 = vld [vmem:[#allocation5 + $0x40] sm:$0xf]  ;;  %v1053_v56 = vor.u32 %v1296_v46, %v1050_v49 }
  0x29   : > { %600 = vmatpush.bf16.msra.mxu2 %v1121_v39  ;;  %v1328_v55 = vld [vmem:[#allocation5 + $0x44] sm:$0xf0]  ;;  %v1295_v57 = vld [vmem:[#allocation2 + $0x14] sm:$0xf0]  ;;  %v1144_v58 = vld [vmem:[#allocation5 + $0xc0] sm:$0xf] }
  0x2a   : > { %471 = vmatpush.bf16.msra.mxu0 %v1065_v24  ;;  %614 = vmatpush.bf16.msra.mxu3 %v1153_v42  ;;  %v1336_v59 = vld [vmem:[#allocation5 + $0xc4] sm:$0xf0]  ;;  %v1294_v60 = vld [vmem:[#allocation2 + $0x14] sm:$0xf]  ;;  %v1042_v61 = vld [vmem:[#allocation2 + $0x18] sm:$0xf0]  ;;  %v1113_v62 = vor.u32 %v1328_v55, %v1112_v54  ;;  %v1041_v63 = vor.u32 %v1295_v57, %v1040_v52 }
  0x2b   : > { %485 = vmatpush.bf16.msra.mxu1 %v1069_v29  ;;  %v1145_v0 = vor.u32 %v1336_v59, %v1144_v58  ;;  %v1045_v1 = vor.u32 %v1294_v60, %v1042_v61  ;;  %v1032_v2 = vld [vmem:[#allocation2] sm:$0xf]  ;;  %v1293_v3 = vld [vmem:[#allocation2 + $0x4] sm:$0xf0]  ;;  %s1022_s26 = sshll.u32 %s1744_s23, 2  ;;  %s1024_s12 = sshll.u32 %s1744_s23, 3 }
  0x2c   : > { %v1292_v4 = vld [vmem:[#allocation2 + $0x4] sm:$0xf]  ;;  %v1034_v5 = vld [vmem:[#allocation2 + $0x8] sm:$0xf0]  ;;  %v1033_v6 = vor.u32 %v1293_v3, %v1032_v2  ;;  %s265_s7 = scalar_lea.vmem %s1729_s0, %s1022_s26  ;;  %v1108_v9 = vld [vmem:[#allocation5 + $0x30] sm:$0xf]  ;;  %s272_s15 = scalar_lea.vmem %s1734_s5, %s1024_s12 }
  0x2d   : > { %601 = vmatpush.bf16.msra.mxu2 %v1117_v50  ;;  %v1037_v7 = vor.u32 %v1292_v4, %v1034_v5  ;;  %v1291_v8 = vld [vmem:[%s265_s7] sm:$0xff]  ;;  %v1327_v10 = vld [vmem:[#allocation5 + $0x34] sm:$0xf0]  ;;  %v1140_v11 = vld [vmem:[#allocation5 + $0xb0] sm:$0xf]  ;;  %s251_s23 = sand.u32 1, %s1545_s19  }
  0x2e   : > { %472 = vmatpush.bf16.msra.mxu0 %v1057_v40  ;;  %615 = vmatpush.bf16.msra.mxu3 %v1149_v53  ;;  %v1109_v12 = vor.u32 %v1327_v10, %v1108_v9  ;;  %v1335_v13 = vld [vmem:[#allocation5 + $0xb4] sm:$0xf0]  ;;  %v1104_v15 = vld [vmem:[#allocation5 + $0x20] sm:$0xf]  ;;  %v1326_v16 = vld [vmem:[#allocation5 + $0x24] sm:$0xf0] }
  0x2f   : > { %486 = vmatpush.bf16.msra.mxu1 %v1061_v45  ;;  %v1141_v14 = vor.u32 %v1335_v13, %v1140_v11  ;;  %v1105_v17 = vor.u32 %v1326_v16, %v1104_v15  ;;  %v1136_v18 = vld [vmem:[#allocation5 + $0xa0] sm:$0xf]  ;;  %v1334_v19 = vld [vmem:[#allocation5 + $0xa4] sm:$0xf0]  ;;  %v1100_v21 = vld [vmem:[#allocation5 + $0x10] sm:$0xf] }
  0x30   : > { %v1137_v20 = vor.u32 %v1334_v19, %v1136_v18  ;;  %v1325_v22 = vld [vmem:[#allocation5 + $0x14] sm:$0xf0]  ;;  %v1132_v23 = vld [vmem:[#allocation5 + $0x90] sm:$0xf]  ;;  %v1096_v27 = vld [vmem:[#allocation5] sm:$0xf] }
  0x31   : > { %602 = vmatpush.bf16.msra.mxu2 %v1113_v62  ;;  %v1101_v24 = vor.u32 %v1325_v22, %v1100_v21  ;;  %v1333_v25 = vld [vmem:[#allocation5 + $0x94] sm:$0xf0]  ;;  %v1324_v28 = vld [vmem:[#allocation5 + $0x4] sm:$0xf0]  ;;  %v1128_v29 = vld [vmem:[#allocation5 + $0x80] sm:$0xf] }
  0x32   : > { %473 = vmatpush.bf16.msra.mxu0 %v1049_v51  ;;  %616 = vmatpush.bf16.msra.mxu3 %v1145_v0  ;;  %v1133_v26 = vor.u32 %v1333_v25, %v1132_v23  ;;  %v1097_v30 = vor.u32 %v1324_v28, %v1096_v27  ;;  %v1332_v31 = vld [vmem:[#allocation5 + $0x84] sm:$0xf0]  ;;  %v1216_v33 = vld [vmem:[#allocation2 + $0xf0] sm:$0xf]  ;;  %v1323_v34 = vld [vmem:[#allocation2 + $0xf4] sm:$0xf0] }
  0x33   : > { %487 = vmatpush.bf16.msra.mxu1 %v1053_v56  ;;  %v1129_v32 = vor.u32 %v1332_v31, %v1128_v29  ;;  %v1322_v35 = vld [vmem:[#allocation2 + $0xf4] sm:$0xf]  ;;  %v1217_v36 = vor.u32 %v1323_v34, %v1216_v33  ;;  %v1218_v37 = vld [vmem:[#allocation2 + $0xf8] sm:$0xf0]  ;;  %v1208_v38 = vld [vmem:[#allocation2 + $0xe0] sm:$0xf] }
  0x34   : > { %v1321_v39 = vld [vmem:[#allocation2 + $0xe4] sm:$0xf0]  ;;  %v1221_v40 = vor.u32 %v1322_v35, %v1218_v37  ;;  %v1320_v41 = vld [vmem:[#allocation2 + $0xe4] sm:$0xf]  ;;  %v1210_v42 = vld [vmem:[#allocation2 + $0xe8] sm:$0xf0] }
  0x35   : > { %603 = vmatpush.bf16.msra.mxu2 %v1109_v12  ;;  %v1209_v43 = vor.u32 %v1321_v39, %v1208_v38  ;;  %v1213_v44 = vor.u32 %v1320_v41, %v1210_v42  ;;  %v1200_v45 = vld [vmem:[#allocation2 + $0xd0] sm:$0xf]  ;;  %v1319_v46 = vld [vmem:[#allocation2 + $0xd4] sm:$0xf0]  ;;  %v1318_v47 = vld [vmem:[#allocation2 + $0xd4] sm:$0xf] }
  0x36   : > { %474 = vmatpush.bf16.msra.mxu0 %v1041_v63  ;;  %617 = vmatpush.bf16.msra.mxu3 %v1141_v14  ;;  %v1202_v48 = vld [vmem:[#allocation2 + $0xd8] sm:$0xf0]  ;;  %v1201_v49 = vor.u32 %v1319_v46, %v1200_v45  ;;  %v1192_v51 = vld [vmem:[#allocation2 + $0xc0] sm:$0xf]  ;;  %v1317_v52 = vld [vmem:[#allocation2 + $0xc4] sm:$0xf0] }
  0x37   : > { %488 = vmatpush.bf16.msra.mxu1 %v1045_v1  ;;  %v1205_v50 = vor.u32 %v1318_v47, %v1202_v48  ;;  %v1316_v53 = vld [vmem:[#allocation2 + $0xc4] sm:$0xf]  ;;  %v1194_v54 = vld [vmem:[#allocation2 + $0xc8] sm:$0xf0]  ;;  %v1193_v55 = vor.u32 %v1317_v52, %v1192_v51  ;;  %v1184_v10 = vld [vmem:[#allocation2 + $0xb0] sm:$0xf] }
  0x38   : > { %v1197_v56 = vor.u32 %v1316_v53, %v1194_v54  ;;  %v372_v57 = vld [vmem:[%s1732_s3] ss:$4 sm:$0x3]  ;;  %v1315_v11 = vld [vmem:[#allocation2 + $0xb4] sm:$0xf0]  ;;  %s1020_s30 = sshll.u32 %s251_s23, 4 }
  0x39   : > { %604 = vmatpush.bf16.msra.mxu2 %v1105_v17  ;;  %v378_v60 = vperm.slane %v372_v57, 0  ;;  %v379_v61 = vperm.slane %v372_v57, 1  ;;  %v1314_v12 = vld [vmem:[#allocation2 + $0xb4] sm:$0xf]  ;;  %v1185_v13 = vor.u32 %v1315_v11, %v1184_v10  ;;  %v1186_v14 = vld [vmem:[#allocation2 + $0xb8] sm:$0xf0] }
  0x3a   : > { %475 = vmatpush.bf16.msra.mxu0 %v1033_v6  ;;  %618 = vmatpush.bf16.msra.mxu3 %v1137_v20  ;;  %v1189_v15 = vor.u32 %v1314_v12, %v1186_v14  ;;  %v1176_v16 = vld [vmem:[#allocation2 + $0xa0] sm:$0xf]  ;;  %v1313_v17 = vld [vmem:[#allocation2 + $0xa4] sm:$0xf0]  ;;  %v1312_v18 = vld [vmem:[#allocation2 + $0xa4] sm:$0xf] }
  0x3b   : > { %489 = vmatpush.bf16.msra.mxu1 %v1037_v7  ;;  %v1177_v19 = vor.u32 %v1313_v17, %v1176_v16  ;;  %v1178_v20 = vld [vmem:[#allocation2 + $0xa8] sm:$0xf0]  ;;  %v1168_v22 = vld [vmem:[#allocation2 + $0x90] sm:$0xf]  ;;  %v1311_v23 = vld [vmem:[#allocation2 + $0x94] sm:$0xf0] }
  0x3c   : > { %v1181_v21 = vor.u32 %v1312_v18, %v1178_v20  ;;  %v1169_v25 = vor.u32 %v1311_v23, %v1168_v22  ;;  %v1160_v28 = vld [vmem:[#allocation2 + $0x80] sm:$0xf]  ;;  %v1309_v29 = vld [vmem:[#allocation2 + $0x84] sm:$0xf0]  ;;  %v1252_v34 = vld [vmem:[#allocation5 + $0x74] sm:$0xf] }
  0x3d   : > { %476 = vmatmul.bf16.vlgmr.msra.gmra.mxu0 %v1291_v8  ;;  %605 = vmatpush.bf16.msra.mxu2 %v1101_v24  ;;  %v1310_v24 = vld [vmem:[#allocation2 + $0x94] sm:$0xf]  ;;  %v1161_v31 = vor.u32 %v1309_v29, %v1160_v28  ;;  %v1347_v35 = vld [vmem:[#allocation5 + $0x78] sm:$0xf0]  ;;  %v1248_v39 = vld [vmem:[#allocation5 + $0x64] sm:$0xf] }
  0x3e   : > { %490 = vmatmul.bf16.vlgmr.msra.gmra.mxu1 %v1291_v8  ;;  %619 = vmatpush.bf16.msra.mxu3 %v1133_v26  ;;  %v1170_v26 = vld [vmem:[#allocation2 + $0x98] sm:$0xf0]  ;;  %v1253_v37 = vor.u32 %v1347_v35, %v1252_v34  ;;  %v1280_v42 = vld [vmem:[#allocation5 + $0xe4] sm:$0xf]  ;;  %v1244_v46 = vld [vmem:[#allocation5 + $0x54] sm:$0xf] }
  0x3f   : > { %715 = vmatpush.bf16.msrb.mxu0 %v1217_v36  ;;  %729 = vmatpush.bf16.msrb.mxu1 %v1221_v40  ;;  %v1173_v27 = vor.u32 %v1310_v24, %v1170_v26  ;;  %v1284_v36 = vld [vmem:[#allocation5 + $0xf4] sm:$0xf]  ;;  %v1355_v38 = vld [vmem:[#allocation5 + $0xf8] sm:$0xf0]  ;;  %v1346_v40 = vld [vmem:[#allocation5 + $0x68] sm:$0xf0] }
  0x40   : > { %v1285_v41 = vor.u32 %v1355_v38, %v1284_v36  ;;  %v1345_v47 = vld [vmem:[#allocation5 + $0x58] sm:$0xf0]  ;;  %v1276_v48 = vld [vmem:[#allocation5 + $0xd4] sm:$0xf]  ;;  %v1240_v52 = vld [vmem:[#allocation5 + $0x44] sm:$0xf] }
  0x41   : > { %606 = vmatpush.bf16.msra.mxu2 %v1097_v30  ;;  %v1308_v30 = vld [vmem:[#allocation2 + $0x84] sm:$0xf]  ;;  %v1344_v53 = vld [vmem:[#allocation5 + $0x48] sm:$0xf0]  ;;  %v1421_v57 = vld [vmem:[%s1732_s3 + $0x1] ss:$0 sm:$0xff] }
  0x42   : > { %620 = vmatpush.bf16.msra.mxu3 %v1129_v32  ;;  %v1162_v32 = vld [vmem:[#allocation2 + $0x88] sm:$0xf0]  ;;  %v1272_v54 = vld [vmem:[#allocation5 + $0xc4] sm:$0xf]  ;;  %v1351_v10 = vld [vmem:[#allocation5 + $0xb8] sm:$0xf0] }
  0x43   : > { %716 = vmatpush.bf16.msrb.mxu0 %v1209_v43  ;;  %730 = vmatpush.bf16.msrb.mxu1 %v1213_v44  ;;  %v1165_v33 = vor.u32 %v1308_v30, %v1162_v32  ;;  %v1354_v43 = vld [vmem:[#allocation5 + $0xe8] sm:$0xf0]  ;;  %v1249_v44 = vor.u32 %v1346_v40, %v1248_v39  ;;  %v1232_v12 = vld [vmem:[#allocation5 + $0x24] sm:$0xf]  ;;  %v1228_v18 = vld [vmem:[#allocation5 + $0x14] sm:$0xf] }
  0x44   : > { %v1281_v45 = vor.u32 %v1354_v43, %v1280_v42  ;;  %v1264_v14 = vld [vmem:[#allocation5 + $0xa4] sm:$0xf]  ;;  %v1350_v16 = vld [vmem:[#allocation5 + $0xa8] sm:$0xf0]  ;;  %v1260_v20 = vld [vmem:[#allocation5 + $0x94] sm:$0xf] }
  0x45   : > { %846 = vmatpush.bf16.msrb.mxu2 %v1253_v37  ;;  %v1265_v17 = vor.u32 %v1350_v16, %v1264_v14  ;;  %v1349_v22 = vld [vmem:[#allocation5 + $0x98] sm:$0xf0]  ;;  %v1224_v24 = vld [vmem:[#allocation5 + $0x4] sm:$0xf]  ;;  %v1348_v28 = vld [vmem:[#allocation5 + $0x88] sm:$0xf0] }
  0x46   : > { %860 = vmatpush.bf16.msrb.mxu3 %v1285_v41  ;;  %v1261_v23 = vor.u32 %v1349_v22, %v1260_v20  ;;  %v1256_v26 = vld [vmem:[#allocation5 + $0x84] sm:$0xf]  ;;  %s253_s7 = scalar_lea.vmem [#allocation7], %s1020_s30  ;;  %s898_s12 = sshll.u32 %s895_s10, 4  ;;  %s899_s12 = int_to_ptr.hbm [resolvable:$true] %s898_s12 }
  0x47   : > { %717 = vmatpush.bf16.msrb.mxu0 %v1201_v49  ;;  %731 = vmatpush.bf16.msrb.mxu1 %v1205_v50  ;;  %v1353_v49 = vld [vmem:[#allocation5 + $0xd8] sm:$0xf0]  ;;  %v1245_v50 = vor.u32 %v1345_v47, %v1244_v46  ;;  %v1257_v29 = vor.u32 %v1348_v28, %v1256_v26  ;;  %v1025_v30 = vld [vmem:[%s1732_s3 + $0x2] ss:$4 sm:$0x3]  ;;  %s896_s11 = sshll.u32 %s253_s7, 4  ;;  %s897_s11 = int_to_ptr.vmem [resolvable:$true] %s896_s11 }
  0x48   : > { %v1277_v51 = vor.u32 %v1353_v49, %v1276_v48  ;;  %v632_v34 = vperm.slane %v1025_v30, 1  ;;  %v1422_v47 = vld [vmem:[%s1732_s3 + $0x3] ss:$0 sm:$0xff]  ;;  %s879_s13 = scalar_lea.sflag [#allocation4], %s251_s23  ;;  %s1497_s14 = sshra.s32 %s899_s12, 4  ;;  %s1498_s14 = int_to_ptr.hbm [resolvable:$true] %s1497_s14 }
  0x49   : > { %847 = vmatpush.bf16.msrb.mxu2 %v1249_v44  ;;  %s1499_s22 = scalar_lea.hbm %s1498_s14, 16  ;;  %p1504_p3 = scmp.lt.s32.totalorder %s1498_s14, %s1733_s4 }
  0x4a   : > { %861 = vmatpush.bf16.msrb.mxu3 %v1281_v45  ;;  %p1500_p0 = scmp.ne.s32.totalorder %s1498_s14, %s1499_s22  ;;  %p1505_p4 = scmp.lt.s32.totalorder %s1503_s17, %s1499_s22 }
  0x4b   : > { %718 = vmatpush.bf16.msrb.mxu0 %v1193_v55  ;;  %732 = vmatpush.bf16.msrb.mxu1 %v1197_v56  ;;  %v1352_v55 = vld [vmem:[#allocation5 + $0xc8] sm:$0xf0]  ;;  %v1241_v56 = vor.u32 %v1344_v53, %v1240_v52 }
  0x4c   : > { %p1501_p1 = pnand %p1500_p0, %p1629_p5  ;;  %p1506_p7 = por %p1505_p4, %p1504_p3 }
  0x4d   : > { %848 = vmatpush.bf16.msrb.mxu2 %v1245_v50 }
  0x4e   : > { %862 = vmatpush.bf16.msrb.mxu3 %v1277_v51  ;;  %p1502_p2 = pneg %p1501_p1 }
  0x4f   : > { %719 = vmatpush.bf16.msrb.mxu0 %v1185_v13  ;;  %733 = vmatpush.bf16.msrb.mxu1 %v1189_v15  ;;  %v1342_v13 = vld [vmem:[#allocation5 + $0x28] sm:$0xf0] }
  0x50   : > { %v1233_v15 = vor.u32 %v1342_v13, %v1232_v12  ;;  %p1507_p8 = pnand %p1506_p7, %p1502_p2 }
  0x51   : > { %849 = vmatpush.bf16.msrb.mxu2 %v1241_v56 }
  0x53   : > { %720 = vmatpush.bf16.msrb.mxu0 %v1177_v19  ;;  %734 = vmatpush.bf16.msrb.mxu1 %v1181_v21  ;;  %v1341_v19 = vld [vmem:[#allocation5 + $0x18] sm:$0xf0] }
  0x54   : > { %v1229_v21 = vor.u32 %v1341_v19, %v1228_v18 }
  0x57   : > { %721 = vmatpush.bf16.msrb.mxu0 %v1169_v25  ;;  %735 = vmatpush.bf16.msrb.mxu1 %v1173_v27  ;;  %v1340_v25 = vld [vmem:[#allocation5 + $0x8] sm:$0xf0] }
  0x58   : > { %v1225_v27 = vor.u32 %v1340_v25, %v1224_v24 }
  0x5b   : > { %722 = vmatpush.bf16.msrb.mxu0 %v1161_v31  ;;  %736 = vmatpush.bf16.msrb.mxu1 %v1165_v33  ;;  %v631_v33 = vperm.slane %v1025_v30, 0 }
  0xba   : > { %v477_v58 = vpop.f32.mrf.mxu0 }
  0xbb   : > { %v491_v59 = vpop.f32.mrf.mxu1  ;;  %v478_v62 = vadd.f32 %v477_v58, %v378_v60  ;;  %v1273_v58 = vor.u32 %v1352_v55, %v1272_v54 }
  0xbc   : > { %v492_v63 = vadd.f32 %v491_v59, %v379_v61 }
  0xbd   : > { %v496_v4 = vmax.f32 %v478_v62, 0.0  ;;  %863 = vmatpush.bf16.msrb.mxu3 %v1273_v58 }
  0xbe   : > { %v497_v6 = vmax.f32 %v492_v63, 0.0 }
  0xc2   : > { %v479_v0 = vpop.f32.mrf.mxu0 }
  0xc3   : > { %v480_v1 = vadd.f32 %v479_v0, %v378_v60  ;;  %v493_v2 = vpop.f32.mrf.mxu1 }
  0xc4   : > { %v494_v3 = vadd.f32 %v493_v2, %v379_v61 }
  0xc5   : > { %v498_v5 = vmax.f32 %v480_v1, 0.0 }
  0xc6   : > { %v499_v7 = vmax.f32 %v494_v3, 0.0 }
  0xc7   : > { %v500_v8 = vpack.c.bf16 %v498_v5, %v496_v4 }
  0xc8   : > { %v501_v9 = vpack.c.bf16 %v499_v7, %v497_v6  ;;  %v1236_v6 = vld [vmem:[#allocation5 + $0x34] sm:$0xf]  ;;  %v1343_v7 = vld [vmem:[#allocation5 + $0x38] sm:$0xf0] }
  0xc9   : > { %607 = vmatmul.bf16.vlgmr.msra.gmra.mxu2 %v500_v8  ;;  %v1268_v8 = vld [vmem:[#allocation5 + $0xb4] sm:$0xf] }
  0xca   : > { %621 = vmatmul.bf16.vlgmr.msra.gmra.mxu3 %v501_v9  ;;  %v1237_v9 = vor.u32 %v1343_v7, %v1236_v6  ;;  %v1269_v11 = vor.u32 %v1351_v10, %v1268_v8 }
  0xcc   : > { %850 = vmatpush.bf16.msrb.mxu2 %v1237_v9  ;;  %864 = vmatpush.bf16.msrb.mxu3 %v1269_v11 }
  0xd0   : > { %851 = vmatpush.bf16.msrb.mxu2 %v1233_v15  ;;  %865 = vmatpush.bf16.msrb.mxu3 %v1265_v17 }
  0xd4   : > { %852 = vmatpush.bf16.msrb.mxu2 %v1229_v21  ;;  %866 = vmatpush.bf16.msrb.mxu3 %v1261_v23 }
  0xd8   : > { %853 = vmatpush.bf16.msrb.mxu2 %v1225_v27  ;;  %867 = vmatpush.bf16.msrb.mxu3 %v1257_v29 }
 0x14c   : > { %v608_v59 = vpop.f32.mrf.mxu2 }
 0x14d   : > { %v609_v60 = vadd.f32 %v1421_v57, %v608_v59  ;;  %v622_v61 = vpop.f32.mrf.mxu3 }
 0x14f   : > { %v623_v62 = vadd.f32 %v622_v61, %v609_v60 }
 0x151   : > { %v627_v63 = vmax.f32 %v623_v62, 0.0 }
 0x153   : > { %876 = vst [vmem:[%s272_s15] sm:$0xff] %v627_v63 }
 0x154   : > { %v610_v0 = vpop.f32.mrf.mxu2 }
 0x155   : > { %v611_v1 = vadd.f32 %v1421_v57, %v610_v0  ;;  %v624_v2 = vpop.f32.mrf.mxu3 }
 0x157   : > { %v625_v3 = vadd.f32 %v624_v2, %v611_v1 }
 0x159   : > { %v628_v4 = vmax.f32 %v625_v3, 0.0 }
 0x15b   : > { %v629_v5 = vpack.c.bf16 %v628_v4, %v627_v63  ;;  %877 = vst [vmem:[%s272_s15 + $0x8] sm:$0xff] %v628_v4 }
 0x15d   : > { %723 = vmatmul.bf16.vlgmr.msrb.gmra.mxu0 %v629_v5  ;;  %737 = vmatmul.bf16.vlgmr.msrb.gmra.mxu1 %v629_v5 }
 0x1da   : > { %v724_v31 = vpop.f32.mrf.mxu0  ;;  %v738_v32 = vpop.f32.mrf.mxu1 }
 0x1db   : > { %v725_v35 = vadd.f32 %v724_v31, %v631_v33  ;;  %v739_v36 = vadd.f32 %v738_v32, %v632_v34 }
 0x1dd   : > { %v743_v41 = vmax.f32 %v725_v35, 0.0  ;;  %v744_v42 = vmax.f32 %v739_v36, 0.0 }
 0x1e2   : > { %v726_v37 = vpop.f32.mrf.mxu0  ;;  %v740_v38 = vpop.f32.mrf.mxu1 }
 0x1e3   : > { %v727_v39 = vadd.f32 %v726_v37, %v631_v33  ;;  %v741_v40 = vadd.f32 %v740_v38, %v632_v34 }
 0x1e5   : > { %v745_v43 = vmax.f32 %v727_v39, 0.0  ;;  %v746_v44 = vmax.f32 %v741_v40, 0.0 }
 0x1e7   : > { %v747_v45 = vpack.c.bf16 %v745_v43, %v743_v41  ;;  %v748_v46 = vpack.c.bf16 %v746_v44, %v744_v42 }
 0x1e9   : > { %854 = vmatmul.bf16.vlgmr.msrb.gmra.mxu2 %v747_v45  ;;  %868 = vmatmul.bf16.vlgmr.msrb.gmra.mxu3 %v748_v46 }
 0x26c   : > { %v855_v48 = vpop.f32.mrf.mxu2  ;;  %v869_v49 = vpop.f32.mrf.mxu3 }
 0x26d   : > { %v856_v50 = vadd.f32 %v1422_v47, %v855_v48 }
 0x26f   : > { %v870_v51 = vadd.f32 %v869_v49, %v856_v50 }
 0x271   : > { %874 = vst [vmem:[%s253_s7] sm:$0xff] %v870_v51 }
 0x274   : > { %v857_v52 = vpop.f32.mrf.mxu2  ;;  %v871_v54 = vpop.f32.mrf.mxu3 }
 0x275   : > { %v858_v53 = vadd.f32 %v1422_v47, %v857_v52 }
 0x277   : > { %v872_v55 = vadd.f32 %v871_v54, %v858_v53 }
 0x279   : > { %875 = vst [vmem:[%s253_s7 + $0x8] sm:$0xff] %v872_v55 }
 0x27a   : > { %1510 = shalt.err (!%p1507_p8)
}
 0x27b   : > { %s1559_s23 = smov 128   ;;  %s1560_s30 = smov 8  }
 0x27c   : > { %1365 = dma.vmem_to_hbm [thread:$0]  (%p1629_p5), %s897_s11, 256, %s899_s12, %s879_s13, %s1559_s23, %s1559_s23, %s1560_s30  }
 0x27d PF: > { %p1382_p9 = scmp.ge.s32.totalorder %s1553_s21, 2  ;;  %s917_s6 = sand.u32 1, %s1541_s18  }
 0x27e   : > { %s918_s7 = scalar_lea.sflag [#allocation4], %s917_s6 }
 0x27f   : > { %p1375_p10 = pnand %p1382_p9, %p1633_p6 }
 0x281   : > { %p1376_p11 = pneg %p1375_p10 }
 0x283   : > { %1536 = dma.done.wait (%p1376_p11), %s918_s7, 256  }
 0x284   : > { %1538 = vsyncadd (%p1376_p11), %s918_s7, 4294967040  ;;  %p18_p12 = scmp.ge.s32.totalorder %s1616_s24, 6   ;;  %s1739_s18 = smov %s1545_s19 }
 0x285   : > { %s1740_s19 = smov %s1549_s20  ;;  %s1741_s20 = smov %s1627_s27 }
 0x286   : > { %s1742_s21 = smov %s1616_s24  ;;  %20 = sbr.rel (!%p18_p12) target bundleno = 5 (0x5), region = 93 }
 0x28b   :  { %932 = vsyncpa [#allocation3], 1 }
 0x28c   :  { %934 = vsyncpa [#allocation3 + $0x1], 1 }
 0x28d   :  { %935 = vsyncpa [#allocation6], 1 }
 0x28e   :  { %936 = vsyncpa [#allocation4], 1 }
 0x28f   :  { %938 = vsyncpa [#allocation4 + $0x1], 1 }

</bundles_post_ra>
